<compile_context>
chip_gen: v7x
topology: tpu7x:2x2x1
jax: 0.10.0
libtpu: 0.0.40
codegen_flags: <defaults>
</compile_context>

<pallas_src>
import jax
import jax.numpy as jnp
from jax.experimental import pallas as pl
from jax.experimental.pallas import tpu as pltpu

LN_EPS = 1e-5


def actor_kernel(obs_ref,
                 w1_ref, b1_ref, g_ref, beta_ref,
                 w2_ref, b2_ref,
                 w3_ref, b3_ref,
                 w4_ref, b4_ref,
                 mu_ref):
    # ---- trunk: Linear -> LayerNorm -> Tanh ----
    # bf16 operands on the MXU, f32 accumulation, f32 elementwise tail.
    obs = obs_ref[...]
    h = jnp.dot(obs.astype(jnp.bfloat16), w1_ref[...],
                preferred_element_type=jnp.float32) + b1_ref[...]
    mean = jnp.mean(h, axis=-1, keepdims=True)
    centered = h - mean
    var = jnp.mean(centered * centered, axis=-1, keepdims=True)
    h = centered * jax.lax.rsqrt(var + LN_EPS)
    h = jnp.tanh(h * g_ref[...] + beta_ref[...])

    # ---- policy MLP: Linear -> ReLU -> Linear -> ReLU -> Linear -> Tanh ----
    x = jnp.dot(h.astype(jnp.bfloat16), w2_ref[...],
                preferred_element_type=jnp.float32) + b2_ref[...]
    x = jnp.maximum(x, 0.0)
    x = jnp.dot(x.astype(jnp.bfloat16), w3_ref[...],
                preferred_element_type=jnp.float32) + b3_ref[...]
    x = jnp.maximum(x, 0.0)
    mu = jnp.dot(x.astype(jnp.bfloat16), w4_ref[...],
                 preferred_element_type=jnp.float32) + b4_ref[...]
    # w4/b4 are zero-padded along the lane dim -> padded columns are tanh(0)=0
    mu_ref[...] = jnp.tanh(mu)


def actor_forward(obs, params, std_scalar, *, tb=64):
    """Returns (mu, std) — the parameters of TruncatedNormal(mu, std)."""
    B, repr_dim = obs.shape
    action_dim = params["w4"].shape[1]

    # Lane-dense output: pad action_dim up to a multiple of 128.
    a_pad = max(128, pl.cdiv(action_dim, 128) * 128)
    w4_p = jnp.pad(params["w4"], ((0, 0), (0, a_pad - action_dim)))
    b4_p = jnp.pad(params["b4"], ((0, 0), (0, a_pad - action_dim)))

    # Pad batch up to a multiple of the batch tile; extra rows are sliced off.
    b_pad = pl.cdiv(B, tb) * tb
    obs_p = obs if b_pad == B else jnp.pad(obs, ((0, b_pad - B), (0, 0)))

    def const_spec(a):
        # Whole array resident in VMEM; constant block index -> fetched once.
        return pl.BlockSpec(a.shape, lambda i: (0, 0))

    # TODO(synk): for production drqbc shapes (repr_dim ~ 39200, f32 w1 ~150MiB)
    # the trunk weight must be K-tiled over an extra "arbitrary" reduction grid
    # axis with a VMEM accumulator; not needed at these shapes.
    mu_pad = pl.pallas_call(
        actor_kernel,
        out_shape=jax.ShapeDtypeStruct((b_pad, a_pad), jnp.float32),
        grid=(b_pad // tb,),
        in_specs=[
            pl.BlockSpec((tb, repr_dim), lambda i: (i, 0)),   # obs tile
            const_spec(params["w1"]), const_spec(params["b1"]),
            const_spec(params["ln_g"]), const_spec(params["ln_b"]),
            const_spec(params["w2"]), const_spec(params["b2"]),
            const_spec(params["w3"]), const_spec(params["b3"]),
            const_spec(w4_p), const_spec(b4_p),
        ],
        out_specs=pl.BlockSpec((tb, a_pad), lambda i: (i, 0)),
        compiler_params=pltpu.CompilerParams(
            dimension_semantics=("parallel",)),
    )(obs_p, params["w1"], params["b1"], params["ln_g"], params["ln_b"],
      params["w2"], params["b2"], params["w3"], params["b3"], w4_p, b4_p)

    mu = mu_pad[:B, :action_dim]
    # std = ones_like(mu) * std : constant -> computed in the wrapper, not the
    # kernel (saves a full output writeback DMA for zero information).
    std = jnp.full((B, action_dim), std_scalar, dtype=mu.dtype)
    return mu, std


def init_params(key, repr_dim, feature_dim, hidden_dim, action_dim):
    """Deterministic synthetic init (stand-in for utils.weight_init).
    Weights are stored pre-transposed as [in, out], in bfloat16 (MXU-native);
    biases / LayerNorm affine stay in f32."""
    ks = jax.random.split(key, 8)
    scale = 0.1
    bf16 = jnp.bfloat16
    p = {
        "w1": (scale * jax.random.normal(ks[0], (repr_dim, feature_dim), jnp.float32)).astype(bf16),
        "b1": scale * jax.random.normal(ks[1], (1, feature_dim), jnp.float32),
        "ln_g": jnp.ones((1, feature_dim), jnp.float32),
        "ln_b": jnp.zeros((1, feature_dim), jnp.float32),
        "w2": (scale * jax.random.normal(ks[2], (feature_dim, hidden_dim), jnp.float32)).astype(bf16),
        "b2": scale * jax.random.normal(ks[3], (1, hidden_dim), jnp.float32),
        "w3": (scale * jax.random.normal(ks[4], (hidden_dim, hidden_dim), jnp.float32)).astype(bf16),
        "b3": scale * jax.random.normal(ks[5], (1, hidden_dim), jnp.float32),
        "w4": (scale * jax.random.normal(ks[6], (hidden_dim, action_dim), jnp.float32)).astype(bf16),
        "b4": scale * jax.random.normal(ks[7], (1, action_dim), jnp.float32),
    }
    return p


def actor_ref(obs, params, std_scalar):
    """Pure-JAX reference (same bf16 matmul operands, f32 accumulation)."""
    def mm(a, w):
        return jnp.dot(a.astype(jnp.bfloat16), w,
                       preferred_element_type=jnp.float32)
    h = mm(obs, params["w1"]) + params["b1"]
    mean = jnp.mean(h, axis=-1, keepdims=True)
    var = jnp.mean((h - mean) ** 2, axis=-1, keepdims=True)
    h = (h - mean) * jax.lax.rsqrt(var + LN_EPS)
    h = jnp.tanh(h * params["ln_g"] + params["ln_b"])
    x = jnp.maximum(mm(h, params["w2"]) + params["b2"], 0.0)
    x = jnp.maximum(mm(x, params["w3"]) + params["b3"], 0.0)
    mu = jnp.tanh(mm(x, params["w4"]) + params["b4"])
    std = jnp.full_like(mu, std_scalar)
    return mu, std


if __name__ == "__main__":
    # Small, lane-friendly shapes consistent with the module's forward.
    B, repr_dim, feature_dim, hidden_dim, action_dim = 256, 256, 128, 128, 4

    key = jax.random.PRNGKey(0)
    k_obs, k_par = jax.random.split(key)
    obs = jax.random.normal(k_obs, (B, repr_dim), jnp.float32)
    params = init_params(k_par, repr_dim, feature_dim, hidden_dim, action_dim)
    std_scalar = 0.2

    mu, std = actor_forward(obs, params, std_scalar)
    jax.block_until_ready((mu, std))

    mu_r, std_r = actor_ref(obs, params, std_scalar)
    assert mu.shape == (B, action_dim) and std.shape == (B, action_dim)
    assert jnp.allclose(mu, mu_r, atol=2e-4, rtol=2e-4), "mu mismatch"
    assert jnp.allclose(std, std_r, atol=1e-6), "std mismatch"

    # TODO(synk): TruncatedNormal distribution object (sampling/log_prob) has no
    # kernel-side equivalent; this returns its parameters (mu, std).
    print("KERNEL_OK")
</pallas_src>

<mosaic_0001>
module attributes {stable_mosaic.version = 11 : i64} {
  func.func @actor_kernel(%arg0: i32, %arg1: memref<64x256xf32, #tpu.memory_space<vmem>>, %arg2: memref<256x128xbf16, #tpu.memory_space<vmem>>, %arg3: memref<1x128xf32, #tpu.memory_space<vmem>>, %arg4: memref<1x128xf32, #tpu.memory_space<vmem>>, %arg5: memref<1x128xf32, #tpu.memory_space<vmem>>, %arg6: memref<128x128xbf16, #tpu.memory_space<vmem>>, %arg7: memref<1x128xf32, #tpu.memory_space<vmem>>, %arg8: memref<128x128xbf16, #tpu.memory_space<vmem>>, %arg9: memref<1x128xf32, #tpu.memory_space<vmem>>, %arg10: memref<128x128xbf16, #tpu.memory_space<vmem>>, %arg11: memref<1x128xf32, #tpu.memory_space<vmem>>, %arg12: memref<64x128xf32, #tpu.memory_space<vmem>>) attributes {dimension_semantics = [#tpu.dimension_semantics<parallel>], iteration_bounds = array<i64: 4>, scalar_prefetch = 0 : i64, scratch_operands = 0 : i64, tpu.core_type = #tpu.core_type<tc>, window_params = [{transform_indices = @transform_0, window_bounds = array<i64: 64, 256>}, {pipeline_mode = #tpu.pipeline_mode<synchronous>, transform_indices = @transform_1, window_bounds = array<i64: 256, 128>}, {pipeline_mode = #tpu.pipeline_mode<synchronous>, transform_indices = @transform_2, window_bounds = array<i64: 1, 128>}, {pipeline_mode = #tpu.pipeline_mode<synchronous>, transform_indices = @transform_3, window_bounds = array<i64: 1, 128>}, {pipeline_mode = #tpu.pipeline_mode<synchronous>, transform_indices = @transform_4, window_bounds = array<i64: 1, 128>}, {pipeline_mode = #tpu.pipeline_mode<synchronous>, transform_indices = @transform_5, window_bounds = array<i64: 128, 128>}, {pipeline_mode = #tpu.pipeline_mode<synchronous>, transform_indices = @transform_6, window_bounds = array<i64: 1, 128>}, {pipeline_mode = #tpu.pipeline_mode<synchronous>, transform_indices = @transform_7, window_bounds = array<i64: 128, 128>}, {pipeline_mode = #tpu.pipeline_mode<synchronous>, transform_indices = @transform_8, window_bounds = array<i64: 1, 128>}, {pipeline_mode = #tpu.pipeline_mode<synchronous>, transform_indices = @transform_9, window_bounds = array<i64: 128, 128>}, {pipeline_mode = #tpu.pipeline_mode<synchronous>, transform_indices = @transform_10, window_bounds = array<i64: 1, 128>}, {transform_indices = @transform_11, window_bounds = array<i64: 64, 128>}]} {
    %c0 = arith.constant 0 : index
    %c0_0 = arith.constant 0 : index
    %0 = vector.load %arg1[%c0, %c0_0] : memref<64x256xf32, #tpu.memory_space<vmem>>, vector<64x256xf32>
    %1 = arith.truncf %0 : vector<64x256xf32> to vector<64x256xbf16>
    %c0_1 = arith.constant 0 : index
    %c0_2 = arith.constant 0 : index
    %2 = vector.load %arg2[%c0_1, %c0_2] : memref<256x128xbf16, #tpu.memory_space<vmem>>, vector<256x128xbf16>
    %cst = arith.constant dense<0.000000e+00> : vector<64x128xf32>
    %3 = tpu.matmul %1, %2, %cst {dimension_numbers = #tpu.dot_dimension_numbers<[1], [0], [0], [1], [0, 0, 1, 1], [], []>} : vector<64x256xbf16>, vector<256x128xbf16>, vector<64x128xf32> -> vector<64x128xf32>
    %c0_3 = arith.constant 0 : index
    %c0_4 = arith.constant 0 : index
    %4 = vector.load %arg3[%c0_3, %c0_4] : memref<1x128xf32, #tpu.memory_space<vmem>>, vector<1x128xf32>
    %5 = vector.broadcast %4 : vector<1x128xf32> to vector<64x128xf32>
    %6 = arith.addf %3, %5 : vector<64x128xf32>
    %cst_5 = arith.constant dense<0.000000e+00> : vector<64xf32>
    %7 = vector.multi_reduction <add>, %6, %cst_5 [1] : vector<64x128xf32> to vector<64xf32>
    %8 = vector.shape_cast %7 : vector<64xf32> to vector<64x1xf32>
    %cst_6 = arith.constant 1.280000e+02 : f32
    %9 = vector.broadcast %cst_6 : f32 to vector<64x1xf32>
    %10 = arith.divf %8, %9 : vector<64x1xf32>
    %11 = vector.broadcast %10 : vector<64x1xf32> to vector<64x128xf32>
    %12 = arith.subf %6, %11 : vector<64x128xf32>
    %13 = arith.mulf %12, %12 : vector<64x128xf32>
    %cst_7 = arith.constant dense<0.000000e+00> : vector<64xf32>
    %14 = vector.multi_reduction <add>, %13, %cst_7 [1] : vector<64x128xf32> to vector<64xf32>
    %15 = vector.shape_cast %14 : vector<64xf32> to vector<64x1xf32>
    %cst_8 = arith.constant 1.280000e+02 : f32
    %16 = vector.broadcast %cst_8 : f32 to vector<64x1xf32>
    %17 = arith.divf %15, %16 : vector<64x1xf32>
    %cst_9 = arith.constant 9.99999974E-6 : f32
    %18 = vector.broadcast %cst_9 : f32 to vector<64x1xf32>
    %19 = arith.addf %17, %18 : vector<64x1xf32>
    %20 = math.rsqrt %19 : vector<64x1xf32>
    %21 = vector.broadcast %20 : vector<64x1xf32> to vector<64x128xf32>
    %22 = arith.mulf %12, %21 : vector<64x128xf32>
    %c0_10 = arith.constant 0 : index
    %c0_11 = arith.constant 0 : index
    %23 = vector.load %arg4[%c0_10, %c0_11] : memref<1x128xf32, #tpu.memory_space<vmem>>, vector<1x128xf32>
    %24 = vector.broadcast %23 : vector<1x128xf32> to vector<64x128xf32>
    %25 = arith.mulf %22, %24 : vector<64x128xf32>
    %c0_12 = arith.constant 0 : index
    %c0_13 = arith.constant 0 : index
    %26 = vector.load %arg5[%c0_12, %c0_13] : memref<1x128xf32, #tpu.memory_space<vmem>>, vector<1x128xf32>
    %27 = vector.broadcast %26 : vector<1x128xf32> to vector<64x128xf32>
    %28 = arith.addf %25, %27 : vector<64x128xf32>
    %29 = math.tanh %28 : vector<64x128xf32>
    %30 = arith.truncf %29 : vector<64x128xf32> to vector<64x128xbf16>
    %c0_14 = arith.constant 0 : index
    %c0_15 = arith.constant 0 : index
    %31 = vector.load %arg6[%c0_14, %c0_15] : memref<128x128xbf16, #tpu.memory_space<vmem>>, vector<128x128xbf16>
    %cst_16 = arith.constant dense<0.000000e+00> : vector<64x128xf32>
    %32 = tpu.matmul %30, %31, %cst_16 {dimension_numbers = #tpu.dot_dimension_numbers<[1], [0], [0], [1], [0, 0, 1, 1], [], []>} : vector<64x128xbf16>, vector<128x128xbf16>, vector<64x128xf32> -> vector<64x128xf32>
    %c0_17 = arith.constant 0 : index
    %c0_18 = arith.constant 0 : index
    %33 = vector.load %arg7[%c0_17, %c0_18] : memref<1x128xf32, #tpu.memory_space<vmem>>, vector<1x128xf32>
    %34 = vector.broadcast %33 : vector<1x128xf32> to vector<64x128xf32>
    %35 = arith.addf %32, %34 : vector<64x128xf32>
    %cst_19 = arith.constant 0.000000e+00 : f32
    %36 = vector.broadcast %cst_19 : f32 to vector<64x128xf32>
    %37 = arith.maximumf %35, %36 : vector<64x128xf32>
    %38 = arith.truncf %37 : vector<64x128xf32> to vector<64x128xbf16>
    %c0_20 = arith.constant 0 : index
    %c0_21 = arith.constant 0 : index
    %39 = vector.load %arg8[%c0_20, %c0_21] : memref<128x128xbf16, #tpu.memory_space<vmem>>, vector<128x128xbf16>
    %cst_22 = arith.constant dense<0.000000e+00> : vector<64x128xf32>
    %40 = tpu.matmul %38, %39, %cst_22 {dimension_numbers = #tpu.dot_dimension_numbers<[1], [0], [0], [1], [0, 0, 1, 1], [], []>} : vector<64x128xbf16>, vector<128x128xbf16>, vector<64x128xf32> -> vector<64x128xf32>
    %c0_23 = arith.constant 0 : index
    %c0_24 = arith.constant 0 : index
    %41 = vector.load %arg9[%c0_23, %c0_24] : memref<1x128xf32, #tpu.memory_space<vmem>>, vector<1x128xf32>
    %42 = vector.broadcast %41 : vector<1x128xf32> to vector<64x128xf32>
    %43 = arith.addf %40, %42 : vector<64x128xf32>
    %cst_25 = arith.constant 0.000000e+00 : f32
    %44 = vector.broadcast %cst_25 : f32 to vector<64x128xf32>
    %45 = arith.maximumf %43, %44 : vector<64x128xf32>
    %46 = arith.truncf %45 : vector<64x128xf32> to vector<64x128xbf16>
    %c0_26 = arith.constant 0 : index
    %c0_27 = arith.constant 0 : index
    %47 = vector.load %arg10[%c0_26, %c0_27] : memref<128x128xbf16, #tpu.memory_space<vmem>>, vector<128x128xbf16>
    %cst_28 = arith.constant dense<0.000000e+00> : vector<64x128xf32>
    %48 = tpu.matmul %46, %47, %cst_28 {dimension_numbers = #tpu.dot_dimension_numbers<[1], [0], [0], [1], [0, 0, 1, 1], [], []>} : vector<64x128xbf16>, vector<128x128xbf16>, vector<64x128xf32> -> vector<64x128xf32>
    %c0_29 = arith.constant 0 : index
    %c0_30 = arith.constant 0 : index
    %49 = vector.load %arg11[%c0_29, %c0_30] : memref<1x128xf32, #tpu.memory_space<vmem>>, vector<1x128xf32>
    %50 = vector.broadcast %49 : vector<1x128xf32> to vector<64x128xf32>
    %51 = arith.addf %48, %50 : vector<64x128xf32>
    %52 = math.tanh %51 : vector<64x128xf32>
    %c0_31 = arith.constant 0 : index
    %c0_32 = arith.constant 0 : index
    %53 = vector.load %arg12[%c0_31, %c0_32] : memref<64x128xf32, #tpu.memory_space<vmem>>, vector<64x128xf32>
    tpu.vector_store %arg12[%c0_31, %c0_32], %52 {strides = array<i32>} : memref<64x128xf32, #tpu.memory_space<vmem>>, vector<64x128xf32>,
    return
  }
  func.func @transform_0(%arg0: i32) -> (i32, i32) {
    %c0_i32 = arith.constant 0 : i32
    %c0_i32_0 = arith.constant 0 : i32
    return %arg0, %c0_i32 : i32, i32
  }
  func.func @transform_1(%arg0: i32) -> (i32, i32) {
    %c0_i32 = arith.constant 0 : i32
    %c0_i32_0 = arith.constant 0 : i32
    %c0_i32_1 = arith.constant 0 : i32
    return %c0_i32, %c0_i32_0 : i32, i32
  }
  func.func @transform_2(%arg0: i32) -> (i32, i32) {
    %c0_i32 = arith.constant 0 : i32
    %c0_i32_0 = arith.constant 0 : i32
    %c0_i32_1 = arith.constant 0 : i32
    return %c0_i32, %c0_i32_0 : i32, i32
  }
  func.func @transform_3(%arg0: i32) -> (i32, i32) {
    %c0_i32 = arith.constant 0 : i32
    %c0_i32_0 = arith.constant 0 : i32
    %c0_i32_1 = arith.constant 0 : i32
    return %c0_i32, %c0_i32_0 : i32, i32
  }
  func.func @transform_4(%arg0: i32) -> (i32, i32) {
    %c0_i32 = arith.constant 0 : i32
    %c0_i32_0 = arith.constant 0 : i32
    %c0_i32_1 = arith.constant 0 : i32
    return %c0_i32, %c0_i32_0 : i32, i32
  }
  func.func @transform_5(%arg0: i32) -> (i32, i32) {
    %c0_i32 = arith.constant 0 : i32
    %c0_i32_0 = arith.constant 0 : i32
    %c0_i32_1 = arith.constant 0 : i32
    return %c0_i32, %c0_i32_0 : i32, i32
  }
  func.func @transform_6(%arg0: i32) -> (i32, i32) {
    %c0_i32 = arith.constant 0 : i32
    %c0_i32_0 = arith.constant 0 : i32
    %c0_i32_1 = arith.constant 0 : i32
    return %c0_i32, %c0_i32_0 : i32, i32
  }
  func.func @transform_7(%arg0: i32) -> (i32, i32) {
    %c0_i32 = arith.constant 0 : i32
    %c0_i32_0 = arith.constant 0 : i32
    %c0_i32_1 = arith.constant 0 : i32
    return %c0_i32, %c0_i32_0 : i32, i32
  }
  func.func @transform_8(%arg0: i32) -> (i32, i32) {
    %c0_i32 = arith.constant 0 : i32
    %c0_i32_0 = arith.constant 0 : i32
    %c0_i32_1 = arith.constant 0 : i32
    return %c0_i32, %c0_i32_0 : i32, i32
  }
  func.func @transform_9(%arg0: i32) -> (i32, i32) {
    %c0_i32 = arith.constant 0 : i32
    %c0_i32_0 = arith.constant 0 : i32
    %c0_i32_1 = arith.constant 0 : i32
    return %c0_i32, %c0_i32_0 : i32, i32
  }
  func.func @transform_10(%arg0: i32) -> (i32, i32) {
    %c0_i32 = arith.constant 0 : i32
    %c0_i32_0 = arith.constant 0 : i32
    %c0_i32_1 = arith.constant 0 : i32
    return %c0_i32, %c0_i32_0 : i32, i32
  }
  func.func @transform_11(%arg0: i32) -> (i32, i32) {
    %c0_i32 = arith.constant 0 : i32
    %c0_i32_0 = arith.constant 0 : i32
    return %arg0, %c0_i32 : i32, i32
  }
}

</mosaic_0001>

<bundles_post_ra>
// kernel: tpu_custom_call.1
= control target key start
LH: loop header
LB: loop body
LE: loop exit
PB: predicated region body
PF: predicated region fallthrough
CT: control target
= control target key end

     0   :  { %s2450_s0 = inlined_call_operand.hbm [shape: f32[256,256], index: 0, kind: input, shape index: {}]   ;;  %s2451_s1 = inlined_call_operand.hbm [shape: bf16[256,128], index: 1, kind: input, shape index: {}]   ;;  %s2452_s2 = inlined_call_operand.vmem [shape: f32[1,128], index: 2, kind: input, shape index: {}]   ;;  %s2453_s3 = inlined_call_operand.vmem [shape: f32[1,128], index: 3, kind: input, shape index: {}]   ;;  %s2454_s4 = inlined_call_operand.vmem [shape: f32[1,128], index: 4, kind: input, shape index: {}]   ;;  %s2455_s5 = inlined_call_operand.hbm [shape: bf16[128,128], index: 5, kind: input, shape index: {}]   ;;  %s2456_s6 = inlined_call_operand.vmem [shape: f32[1,128], index: 6, kind: input, shape index: {}]   ;;  %s2457_s7 = inlined_call_operand.hbm [shape: bf16[128,128], index: 7, kind: input, shape index: {}]   ;;  %s2458_s8 = inlined_call_operand.vmem [shape: f32[1,128], index: 8, kind: input, shape index: {}]   ;;  %s2459_s9 = inlined_call_operand.hbm [shape: bf16[128,128], index: 9, kind: input, shape index: {}]   ;;  %s2460_s10 = inlined_call_operand.vmem [shape: f32[1,128], index: 10, kind: input, shape index: {}]   ;;  %s2461_s11 = inlined_call_operand.hbm [shape: f32[256,128], index: 11, kind: output, shape index: {}]  }
   0x1   :  { %2468 = sst [smem:[#allocation18_spill]] %s2458_s8 }
   0x2   :  { %2469 = sst [smem:[#allocation19_spill]] %s2460_s10 }
   0x3   :  { %2470 = sst [smem:[#allocation20_spill]] %s2461_s11 }
   0x4   :  { %16 = vsyncpa [#allocation3], 0 }
   0x5   :  { %18 = vsyncpa [#allocation3 + $0x1], 0 }
   0x6   :  { %19 = vsyncpa [#allocation6], 0 }
   0x7   :  { %20 = vsyncpa [#allocation9], 0 }
   0x8   :  { %21 = vsyncpa [#allocation4], 0 }
   0x9   :  { %23 = vsyncpa [#allocation4 + $0x1], 0  ;;  %s2086_s17 = smov 0   ;;  %s2088_s18 = smov 0  }
   0xa   :  { %s2090_s19 = smov 0   ;;  %s2092_s20 = smov 0  }
   0xb LB: > { %2471 = sst [smem:[#allocation16_spill]] %s2000_s17  ;;  %s2107_s21 = sadd.s32 4294967295, %s2012_s20   ;;  %s2012_s20 = sphi %s2092_s20, %s2496_s20   ;;  %s2008_s19 = sphi %s2090_s19, %s2495_s19   ;;  %s2004_s18 = sphi %s2088_s18, %s2494_s18   ;;  %s2000_s17 = sphi %s2086_s17, %s2493_s17  }
   0xc   : > { %s1395_s22 = sadd.s32 4294967294, %s2012_s20   ;;  %p49_p0 = scmp.ne.s32.totalorder %s2004_s18, %s2000_s17 }
   0xd   : > { %p2463_p1 = scmp.eq.s32.totalorder %s2107_s21, 0  ;;  %p289_p3 = scmp.eq.s32.totalorder %s1395_s22, 3 }
   0xe   : > { %p1396_p5 = scmp.ge.s32.totalorder %s2012_s20, 1  ;;  %p296_p7 = scmp.lt.s32.totalorder %s2012_s20, 5 }
   0xf   : > { %p2116_p4 = por %p2463_p1, %p49_p0  ;;  %p2121_p6 = por %p289_p3, %p49_p0 }
  0x10   : > { %p2126_p8 = pnand %p1396_p5, %p296_p7  ;;  %s2014_s26 = smov [#allocation5]  }
  0x11   : > { %s2472_s23 = scalar_select %p2116_p4, 1, 0 }
  0x12   : > { %s2473_s24 = scalar_select %p2121_p6, 1, 0 }
  0x13   : > { %s2475_s25 = scalar_select %p2126_p8, 1, 0 }
  0x14   : > { %2474 = sst [smem:[#allocation17_spill]] %s2473_s24  ;;  %s308_s27 = sshll.u32 %s2014_s26, 4  ;;  %s2130_s27 = int_to_ptr.vmem [resolvable:$true] %s308_s27 }
  0x15   : > { %p1635_p9 = pneg %p2126_p8  ;;  %s2015_s29 = smov [#allocation8]  }
  0x16   : > { %s346_s30 = sshll.u32 %s2015_s29, 4  ;;  %s2016_s12 = smov [#allocation7]   ;;  %s2140_s30 = int_to_ptr.vmem [resolvable:$true] %s346_s30 }
  0x17   : > { %p2136_p10 = pnand %p1635_p9, %p2463_p1  ;;  %s2142_s13 = sshll.u32 %s2016_s12, 4  ;;  %s331_s13 = int_to_ptr.vmem [resolvable:$true] %s2142_s13 }
  0x18   : > { %s1796_s16 = scalar_lea.hbm %s2451_s1, 2048 }
  0x19   : > { %p1797_p11 = scmp.ne.s32.totalorder %s2451_s1, %s1796_s16  ;;  %p2152_p12 = pneg %p2136_p10 }
  0x1a   : > { %p1803_p3 = scmp.lt.u32.totalorder %s1796_s16, %s2451_s1 }
  0x1b   : > { %p1799_p13 = pnand %p2152_p12, %p1797_p11 }
  0x1d   : > { %p1800_p0 = pneg %p1799_p13 }
  0x1f   : > { %p1805_p5 = pnand %p1803_p3, %p1800_p0 }
  0x21   : > { %1808 = shalt.err (!%p1805_p5)
}
  0x22   : > { %s1809_s14 = scalar_lea.vmem %s2130_s27, 2048  ;;  %p1817_p2 = scmp.lt.s32.totalorder %s2130_s27, %s2130_s27 }
  0x23   : > { %p1810_p7 = scmp.ne.s32.totalorder %s2130_s27, %s1809_s14  ;;  %p1818_p6 = scmp.lt.s32.totalorder %s1809_s14, %s1809_s14 }
  0x25   : > { %p1812_p9 = pnand %p1810_p7, %p2152_p12  ;;  %p1819_p11 = por %p1818_p6, %p1817_p2 }
  0x27   : > { %p1813_p1 = pneg %p1812_p9 }
  0x29   : > { %p1820_p13 = pnand %p1819_p11, %p1813_p1 }
  0x2b   : > { %1823 = shalt.err (!%p1820_p13)
}
  0x2c   : > { %s2017_s15 = smov 64   ;;  %s2018_s16 = smov 4  }
  0x2d   : > { %1638 = dma.hbm_to_vmem [thread:$0]  (!%p2136_p10), %s2451_s1, 2048, %s2130_s27, [#allocation6], %s2017_s15, %s2017_s15, %s2018_s16  }
  0x2e   : > { %s1824_s14 = scalar_lea.hbm %s2457_s7, 1024 }
  0x2f   : > { %p1825_p1 = scmp.ne.s32.totalorder %s2457_s7, %s1824_s14  ;;  %p1831_p0 = scmp.lt.u32.totalorder %s1824_s14, %s2457_s7 }
  0x31   : > { %p1827_p2 = pnand %p1825_p1, %p2152_p12 }
  0x33   : > { %p1828_p6 = pneg %p1827_p2 }
  0x35   : > { %p1833_p3 = pnand %p1831_p0, %p1828_p6 }
  0x37   : > { %1836 = shalt.err (!%p1833_p3)
}
  0x38   : > { %s1837_s27 = scalar_lea.vmem %s2140_s30, 1024  ;;  %p1845_p11 = scmp.lt.s32.totalorder %s2140_s30, %s2140_s30 }
  0x39   : > { %p1838_p5 = scmp.ne.s32.totalorder %s2140_s30, %s1837_s27  ;;  %p1846_p13 = scmp.lt.s32.totalorder %s1837_s27, %s1837_s27 }
  0x3b   : > { %p1840_p7 = pnand %p1838_p5, %p2152_p12  ;;  %p1847_p1 = por %p1846_p13, %p1845_p11 }
  0x3d   : > { %p1841_p9 = pneg %p1840_p7 }
  0x3f   : > { %p1848_p2 = pnand %p1847_p1, %p1841_p9 }
  0x41   : > { %1851 = shalt.err (!%p1848_p2)
}
  0x42   : > { %1644 = dma.hbm_to_vmem [thread:$0]  (!%p2136_p10), %s2457_s7, 1024, %s2140_s30, [#allocation9], %s2017_s15, %s2017_s15, %s2018_s16  }
  0x43   : > { %s1852_s22 = scalar_lea.hbm %s2455_s5, 1024 }
  0x44   : > { %p1853_p6 = scmp.ne.s32.totalorder %s2455_s5, %s1852_s22  ;;  %p1859_p5 = scmp.lt.u32.totalorder %s1852_s22, %s2455_s5 }
  0x46   : > { %p1855_p0 = pnand %p1853_p6, %p2152_p12 }
  0x48   : > { %p1856_p3 = pneg %p1855_p0 }
  0x4a   : > { %p1861_p7 = pnand %p1859_p5, %p1856_p3 }
  0x4c   : > { %1864 = shalt.err (!%p1861_p7)
}
  0x4d   : > { %s1865_s27 = scalar_lea.vmem %s331_s13, 1024  ;;  %p1873_p1 = scmp.lt.s32.totalorder %s331_s13, %s331_s13 }
  0x4e   : > { %p1866_p9 = scmp.ne.s32.totalorder %s331_s13, %s1865_s27  ;;  %p1874_p2 = scmp.lt.s32.totalorder %s1865_s27, %s1865_s27 }
  0x50   : > { %p1868_p11 = pnand %p1866_p9, %p2152_p12  ;;  %p1875_p4 = por %p1874_p2, %p1873_p1 }
  0x52   : > { %p1869_p13 = pneg %p1868_p11 }
  0x54   : > { %p1876_p8 = pnand %p1875_p4, %p1869_p13 }
  0x56   : > { %1879 = shalt.err (!%p1876_p8)
}
  0x57   : > { %1641 = dma.hbm_to_vmem [thread:$0]  (!%p2136_p10), %s2455_s5, 1024, %s331_s13, [#allocation6], %s2017_s15, %s2017_s15, %s2018_s16  }
  0x58   : > { %s2019_s10 = smov [#allocation10]   ;;  %s1880_s26 = scalar_lea.hbm %s2459_s9, 1024 }
  0x59   : > { %s362_s11 = sshll.u32 %s2019_s10, 4  ;;  %p1881_p4 = scmp.ne.s32.totalorder %s2459_s9, %s1880_s26  ;;  %s363_s11 = int_to_ptr.vmem [resolvable:$true] %s362_s11 }
  0x5a   : > { %p1887_p0 = scmp.lt.u32.totalorder %s1880_s26, %s2459_s9 }
  0x5b   : > { %p1883_p8 = pnand %p1881_p4, %p2152_p12 }
  0x5d   : > { %p1884_p6 = pneg %p1883_p8 }
  0x5f   : > { %p1889_p3 = pnand %p1887_p0, %p1884_p6 }
  0x61   : > { %1892 = shalt.err (!%p1889_p3)
}
  0x62   : > { %s1893_s13 = scalar_lea.vmem %s363_s11, 1024  ;;  %p1901_p11 = scmp.lt.s32.totalorder %s363_s11, %s363_s11 }
  0x63   : > { %p1894_p5 = scmp.ne.s32.totalorder %s363_s11, %s1893_s13  ;;  %p1902_p13 = scmp.lt.s32.totalorder %s1893_s13, %s1893_s13 }
  0x65   : > { %p1896_p7 = pnand %p1894_p5, %p2152_p12  ;;  %p1903_p1 = por %p1902_p13, %p1901_p11 }
  0x67   : > { %p1897_p9 = pneg %p1896_p7 }
  0x69   : > { %p1904_p2 = pnand %p1903_p1, %p1897_p9 }
  0x6b   : > { %1907 = shalt.err (!%p1904_p2)
}
  0x6c   : > { %1647 = dma.hbm_to_vmem [thread:$0]  (!%p2136_p10), %s2459_s9, 1024, %s363_s11, [#allocation9], %s2017_s15, %s2017_s15, %s2018_s16  }
  0x6d   : > { %s2246_s24 = sadd.s32 1, %s2012_s20   ;;  %s36_s28 = sadd.s32 1, %s2008_s19 }
  0x6e   : > { %s33_s10 = ssub.s32 %s2012_s20, %s2246_s24  ;;  %p43_p12 = scmp.ne.s32.totalorder %s2008_s19, %s2004_s18 }
  0x6f   : > { %p34_p4 = scmp.eq.s32.totalorder %s33_s10, 0  ;;  %p44_p8 = scmp.eq.s32.totalorder %s2012_s20, 0 }
  0x70   : > { %p2478_p6 = scmp.eq.s32.totalorder %s2107_s21, 3  ;;  %p1660_p3 = scmp.lt.s32.totalorder %s2012_s20, 4 }
  0x71   : > { %s2262_s22 = scalar_select %p34_p4, %s2008_s19, %s36_s28  }
  0x72   : > { %p2256_p0 = por %p2478_p6, %p43_p12  ;;  %p45_p5 = por %p44_p8, %p43_p12 }
  0x73   : > { %s379_s26 = sand.u32 1, %s2008_s19   ;;  %s1465_s15 = sshll.u32 %s2012_s20, 11 }
  0x74   : > { %s1402_s29 = sshll.u32 %s379_s26, 7  ;;  %s2269_s12 = scalar_lea.hbm %s2450_s0, %s1465_s15 }
  0x75   : > { %s383_s14 = scalar_lea.vmem [#allocation2], %s1402_s29  ;;  %p2273_p10 = pnand %p1660_p3, %p45_p5 }
  0x76   : > { %s391_s27 = sshll.u32 %s383_s14, 4  ;;  %s2277_s30 = scalar_lea.sflag [#allocation3], %s379_s26  ;;  %s2271_s27 = int_to_ptr.vmem [resolvable:$true] %s391_s27 }
  0x77   : > { %s1908_s8 = scalar_lea.hbm %s2269_s12, 2048  ;;  %p1910_p9 = pneg %p2273_p10 }
  0x78   : > { %p1909_p7 = scmp.ne.s32.totalorder %s2269_s12, %s1908_s8  ;;  %s1913_s29 = scalar_lea.hbm %s2450_s0, 8192 }
  0x79   : > { %p1914_p1 = scmp.lt.u32.totalorder %s2269_s12, %s2450_s0  ;;  %p1915_p2 = scmp.lt.u32.totalorder %s1913_s29, %s1908_s8 }
  0x7a   : > { %p1911_p11 = pnand %p1910_p9, %p1909_p7  ;;  %p1917_p4 = scmp.lt.u32.totalorder %s1908_s8, %s2269_s12 }
  0x7b   : > { %p1916_p12 = por %p1915_p2, %p1914_p1 }
  0x7c   : > { %p1912_p13 = pneg %p1911_p11 }
  0x7d   : > { %p1918_p8 = por %p1917_p4, %p1916_p12 }
  0x7f   : > { %p1919_p6 = pnand %p1918_p8, %p1912_p13 }
  0x81   : > { %1922 = shalt.err (!%p1919_p6)
}
  0x82   : > { %s1923_s26 = scalar_lea.vmem %s2271_s27, 2048  ;;  %s2020_s11 = smov [#allocation2]  }
  0x83   : > { %p1924_p3 = scmp.ne.s32.totalorder %s2271_s27, %s1923_s26  ;;  %s1928_s14 = sshll.u32 %s2020_s11, 4  ;;  %s1929_s14 = int_to_ptr.vmem [resolvable:$false] %s1928_s14 }
  0x84   : > { %s1930_s28 = scalar_lea.vmem %s1929_s14, 4096  ;;  %p1931_p11 = scmp.lt.s32.totalorder %s2271_s27, %s1929_s14 }
  0x85   : > { %p1926_p5 = pnand %p1924_p3, %p1910_p9  ;;  %p1932_p1 = scmp.lt.s32.totalorder %s1930_s28, %s1923_s26 }
  0x87   : > { %p1927_p7 = pneg %p1926_p5  ;;  %p1933_p2 = por %p1932_p1, %p1931_p11 }
  0x89   : > { %p1934_p12 = pnand %p1933_p2, %p1927_p7 }
  0x8b   : > { %1937 = shalt.err (!%p1934_p12)
}
  0x8c   : > { %s2021_s8 = smov 256   ;;  %s2022_s10 = smov 16  }
  0x8d   : > { %1651 = dma.hbm_to_vmem [thread:$0]  (!%p2273_p10), %s2269_s12, 2048, %s2271_s27, %s2277_s30, %s2021_s8, %s2021_s8, %s2022_s10  }
  0x8e   : > { %p2481_p9 = scmp.ne.s32.totalorder %s2475_s25, 0 }
  0x8f   : > { %s2308_s29 = sand.u32 (!%p2481_p9), 1, %s2004_s18   ;;  %p2482_p13 = scmp.ne.s32.totalorder (!%p2481_p9), %s2472_s23, 0 }
  0x90   : > { %403 = sbr.rel (%p2481_p9) target bundleno = 1446 (0x5a6), region = 64  ;;  %s1407_s15 = sshll.u32 (!%p2481_p9), %s2308_s29, 7 }
  0x91   : > { %s406_s16 = scalar_lea.sflag (!%p2481_p9), [#allocation3], %s2308_s29  ;;  %s2312_s26 = scalar_lea.vmem (!%p2481_p9), [#allocation2], %s1407_s15 }
  0x97   : > { %1983 = dma.done.wait (%p2482_p13), %s406_s16, 2048  }
  0x98   : > { %1985 = vsyncadd (%p2482_p13), %s406_s16, 4294965248  ;;  %p2483_p10 = scmp.eq.s32.totalorder %s2107_s21, 0 }
  0x9a   : > { %1987 = dma.done.wait (%p2483_p10), [#allocation6], 3072   ;;  %p2484_p4 = pmov %p2483_p10 }
  0x9c   : > { %1989 = vsyncadd (%p2484_p4), [#allocation6], 4294964224  ;;  %p2485_p8 = pmov %p2484_p4 }
  0x9d   : > { %p2486_p6 = pmov %p2484_p4 }
  0x9e   : > { %1991 = dma.done.wait (%p2485_p8), [#allocation9], 2048  }
  0x9f   : > { %1993 = vsyncadd (%p2486_p6), [#allocation9], 4294965248  ;;  %v1708_v0 = vld [vmem:[#allocation5 + $0x40] sm:$0xff]   ;;  %v1710_v2 = vld [vmem:[#allocation5 + $0x48] sm:$0xff]   ;;  %s2487_s10 = sld [smem:[#allocation18_spill]]  ;;  %s1412_s23 = sshll.u32 %s2308_s29, 6 }
  0xa0   : > { %v1709_v1 = vld [vmem:[#allocation5] sm:$0xff]   ;;  %1467 = vmatprep.subr.bf16.mxu0 %v1708_v0  ;;  %v1711_v3 = vld [vmem:[#allocation5 + $0x8] sm:$0xff]   ;;  %v1712_v4 = vld [vmem:[#allocation5 + $0x50] sm:$0xff]   ;;  %s463_s25 = scalar_lea.vmem [#allocation11], %s1412_s23  ;;  %s1466_s12 = sshll.u32 %s2107_s21, 10 }
  0xa1   : > { %1468 = vmatpush3.bf16.msra.mxu0 %v1709_v1  ;;  %v1713_v5 = vld [vmem:[#allocation5 + $0x10] sm:$0xff]   ;;  %v1714_v6 = vld [vmem:[#allocation5 + $0x58] sm:$0xff]   ;;  %v1716_v8 = vld [vmem:[#allocation5 + $0x60] sm:$0xff]   ;;  %s1284_s27 = sshll.u32 %s463_s25, 4  ;;  %s2489_s11 = sld [smem:[#allocation20_spill]]  ;;  %s2407_s27 = int_to_ptr.vmem [resolvable:$true] %s1284_s27 }
  0xa2   : > { %1469 = vmatprep.subr.bf16.mxu0 %v1710_v2  ;;  %v1715_v7 = vld [vmem:[#allocation5 + $0x18] sm:$0xff]   ;;  %v1717_v9 = vld [vmem:[#allocation5 + $0x20] sm:$0xff]   ;;  %v1718_v10 = vld [vmem:[#allocation5 + $0x68] sm:$0xff]   ;;  %s1271_s21 = scalar_lea.sflag [#allocation4], %s2308_s29  ;;  %s1938_s28 = scalar_lea.vmem %s2407_s27, 1024 }
  0xa3   : > { %v468_v11 = vld [vmem:[%s2312_s26 + $0x8] sm:$0xff]  ;;  %v470_v12 = vld [vmem:[%s2312_s26 + $0x18] sm:$0xff]  ;;  %v1720_v15 = vld [vmem:[#allocation5 + $0x70] sm:$0xff]   ;;  %p1939_p3 = scmp.ne.s32.totalorder %s2407_s27, %s1938_s28  ;;  %s2023_s8 = smov [#allocation11]  }
  0xa4   : > { %v484_v13 = vpack.c.bf16 %v470_v12, %v468_v11  ;;  %v1719_v14 = vld [vmem:[#allocation5 + $0x28] sm:$0xff]   ;;  %v1721_v16 = vld [vmem:[#allocation5 + $0x30] sm:$0xff]   ;;  %v1722_v17 = vld [vmem:[#allocation5 + $0x78] sm:$0xff]  }
  0xa5   : > { %1470 = vmatpush3.bf16.msra.mxu0 %v1711_v3  ;;  %v1723_v18 = vld [vmem:[#allocation5 + $0x38] sm:$0xff]   ;;  %v467_v19 = vld [vmem:[%s2312_s26] sm:$0xff]  ;;  %v469_v20 = vld [vmem:[%s2312_s26 + $0x10] sm:$0xff]  ;;  %p1940_p5 = pnand %p1939_p3, %p2256_p0 }
  0xa6   : > { %1471 = vmatprep.subr.bf16.mxu0 %v1712_v4  ;;  %658 = vmatprep.mubr.bf16.mxu0 %v484_v13  ;;  %v472_v21 = vld [vmem:[%s2312_s26 + $0x28] sm:$0xff]  ;;  %v474_v22 = vld [vmem:[%s2312_s26 + $0x38] sm:$0xff]  ;;  %v483_v23 = vpack.c.bf16 %v469_v20, %v467_v19  ;;  %v471_v25 = vld [vmem:[%s2312_s26 + $0x20] sm:$0xff] }
  0xa7   : > { %v486_v24 = vpack.c.bf16 %v474_v22, %v472_v21  ;;  %v473_v26 = vld [vmem:[%s2312_s26 + $0x30] sm:$0xff]  ;;  %v476_v27 = vld [vmem:[%s2312_s26 + $0x48] sm:$0xff]  ;;  %v478_v28 = vld [vmem:[%s2312_s26 + $0x58] sm:$0xff]  ;;  %s2405_s14 = scalar_lea.hbm %s2489_s11, %s1466_s12  ;;  %p1941_p7 = pneg %p1940_p5 }
  0xa8   : > { %v485_v29 = vpack.c.bf16 %v473_v26, %v471_v25  ;;  %v488_v30 = vpack.c.bf16 %v478_v28, %v476_v27  ;;  %v475_v31 = vld [vmem:[%s2312_s26 + $0x40] sm:$0xff]  ;;  %v477_v32 = vld [vmem:[%s2312_s26 + $0x50] sm:$0xff]  ;;  %v480_v33 = vld [vmem:[%s2312_s26 + $0x68] sm:$0xff] }
  0xa9   : > { %1472 = vmatpush3.bf16.msra.mxu0 %v1713_v5  ;;  %v482_v34 = vld [vmem:[%s2312_s26 + $0x78] sm:$0xff]  ;;  %v487_v35 = vpack.c.bf16 %v477_v32, %v475_v31  ;;  %v479_v37 = vld [vmem:[%s2312_s26 + $0x60] sm:$0xff]  ;;  %v481_v38 = vld [vmem:[%s2312_s26 + $0x70] sm:$0xff]  ;;  %s2488_s26 = sld [smem:[#allocation19_spill]] }
  0xaa   : > { %1473 = vmatprep.subr.bf16.mxu0 %v1714_v6  ;;  %v490_v36 = vpack.c.bf16 %v482_v34, %v480_v33  ;;  %v489_v39 = vpack.c.bf16 %v481_v38, %v479_v37  ;;  %v1413_v42 = vld [vmem:[%s2452_s2] ss:$0 sm:$0xff] }
  0xad   : > { %1474 = vmatpush3.bf16.msra.mxu0 %v1715_v7 }
  0xae   : > { %1475 = vmatprep.subr.bf16.mxu0 %v1716_v8 }
  0xb1   : > { %1476 = vmatpush3.bf16.msra.mxu0 %v1717_v9 }
  0xb2   : > { %1477 = vmatprep.subr.bf16.mxu0 %v1718_v10 }
  0xb5   : > { %1478 = vmatpush3.bf16.msra.mxu0 %v1719_v14 }
  0xb6   : > { %1479 = vmatprep.subr.bf16.mxu0 %v1720_v15 }
  0xb9   : > { %1480 = vmatpush3.bf16.msra.mxu0 %v1721_v16 }
  0xba   : > { %1481 = vmatprep.subr.bf16.mxu0 %v1722_v17 }
  0xbd   : > { %1482 = vmatpush3.bf16.msra.mxu0 %v1723_v18 }
  0xc0   : > { %659 = vmatmul.mubr.bf16.vlgmr.msra.gmra.mrb[0].mxu0 %v483_v23 }
  0xc1   : > { %666 = vmatprep.mubr.bf16.mxu0 %v486_v24 }
  0xc8   : > { %667 = vmatmul.mubr.bf16.gmra.mrb[4].mxu0 %v485_v29 }
  0xc9   : > { %674 = vmatprep.mubr.bf16.mxu0 %v488_v30 }
  0xd0   : > { %675 = vmatmul.mubr.bf16.gmra.mrb[8].mxu0 %v487_v35 }
  0xd1   : > { %682 = vmatprep.mubr.bf16.mxu0 %v490_v36 }
  0xd8   : > { %683 = vmatmul.mubr.bf16.gmra.mrb[12].mxu0 %v489_v39 }
 0x193   : > { %v1483_v40 = vpop.f32.mrb[0].mxu0 }
 0x194   : > { %v1484_v41 = vpop.f32.mrb[1].mxu0 }
 0x195   : > { %v1485_v43 = vadd.f32 %v1484_v41, %v1483_v40  ;;  %v1486_v44 = vpop.f32.mrb[2].mxu0  ;;  %v1724_v41 = vld [vmem:[#allocation7] sm:$0xff]  }
 0x196   : > { %v1487_v45 = vpop.f32.mrb[3].mxu0  ;;  %1543 = vmatprep.subr.bf16.mxu1 %v1724_v41 }
 0x197   : > { %v1488_v46 = vadd.f32 %v1487_v45, %v1486_v44  ;;  %v661_v47 = vadd.f32 %v1485_v43, %v1413_v42  ;;  %1544 = vmatpush3.bf16.msra.mxu1 %v1724_v41  ;;  %v1726_v43 = vld [vmem:[#allocation7 + $0x10] sm:$0xff]   ;;  %v1727_v44 = vld [vmem:[#allocation7 + $0x18] sm:$0xff]   ;;  %v1728_v45 = vld [vmem:[#allocation7 + $0x20] sm:$0xff]  }
 0x199   : > { %691 = vadd.xlane.f32.xlu0 %v661_v47  ;;  %v664_v49 = vadd.f32 %v1488_v46, %v1413_v42  ;;  %v1729_v46 = vld [vmem:[#allocation7 + $0x28] sm:$0xff]  }
 0x19b   : > { %v1489_v48 = vpop.f32.mrb[4].mxu0 }
 0x19c   : > { %v1490_v50 = vpop.f32.mrb[5].mxu0 }
 0x19d   : > { %v1491_v51 = vadd.f32 %v1490_v50, %v1489_v48  ;;  %v1492_v52 = vpop.f32.mrb[6].mxu0  ;;  %693 = vadd.xlane.f32.xlu0 %v664_v49  ;;  %v1731_v48 = vld [vmem:[#allocation7 + $0x38] sm:$0xff]   ;;  %v1733_v50 = vld [vmem:[#allocation8 + $0x8] sm:$0xff]  }
 0x19e   : > { %v1493_v53 = vpop.f32.mrb[7].mxu0 }
 0x19f   : > { %v1494_v54 = vadd.f32 %v1493_v53, %v1492_v52  ;;  %v669_v55 = vadd.f32 %v1491_v51, %v1413_v42  ;;  %v1734_v51 = vld [vmem:[#allocation8 + $0x10] sm:$0xff]   ;;  %v1735_v52 = vld [vmem:[#allocation8 + $0x18] sm:$0xff]   ;;  %v1736_v53 = vld [vmem:[#allocation8 + $0x20] sm:$0xff]  }
 0x1a1   : > { %695 = vadd.xlane.f32.xlu1 %v669_v55  ;;  %v672_v57 = vadd.f32 %v1494_v54, %v1413_v42  ;;  %v1737_v54 = vld [vmem:[#allocation8 + $0x28] sm:$0xff]  }
 0x1a3   : > { %v1495_v56 = vpop.f32.mrb[8].mxu0 }
 0x1a4   : > { %v1496_v58 = vpop.f32.mrb[9].mxu0 }
 0x1a5   : > { %v1497_v59 = vadd.f32 %v1496_v58, %v1495_v56  ;;  %v1498_v60 = vpop.f32.mrb[10].mxu0  ;;  %697 = vadd.xlane.f32.xlu1 %v672_v57 }
 0x1a6   : > { %v1499_v61 = vpop.f32.mrb[11].mxu0 }
 0x1a7   : > { %v1500_v62 = vadd.f32 %v1499_v61, %v1498_v60  ;;  %v677_v63 = vadd.f32 %v1497_v59, %v1413_v42 }
 0x1a9   : > { %699 = vadd.xlane.f32.xlu0 %v677_v63  ;;  %v680_v0 = vadd.f32 %v1500_v62, %v1413_v42 }
 0x1ab   : > { %v1501_v1 = vpop.f32.mrb[12].mxu0  ;;  %701 = vadd.xlane.f32.xlu1 %v680_v0 }
 0x1ac   : > { %v1502_v2 = vpop.f32.mrb[13].mxu0 }
 0x1ad   : > { %v1503_v3 = vadd.f32 %v1502_v2, %v1501_v1  ;;  %v1504_v4 = vpop.f32.mrb[14].mxu0 }
 0x1ae   : > { %v1505_v5 = vpop.f32.mrb[15].mxu0 }
 0x1af   : > { %v1506_v6 = vadd.f32 %v1505_v5, %v1504_v4  ;;  %v685_v7 = vadd.f32 %v1503_v3, %v1413_v42  ;;  %v1430_v3 = vld [vmem:[%s2453_s3] ss:$0 sm:$0xff] }
 0x1b1   : > { %703 = vadd.xlane.f32.xlu0 %v685_v7  ;;  %v688_v8 = vadd.f32 %v1506_v6, %v1413_v42  ;;  %v1725_v42 = vld [vmem:[#allocation7 + $0x8] sm:$0xff]  }
 0x1b2   : > { %1545 = vmatprep.subr.bf16.mxu1 %v1725_v42 }
 0x1b3   : > { %705 = vadd.xlane.f32.xlu1 %v688_v8  ;;  %1546 = vmatpush3.bf16.msra.mxu1 %v1725_v42 }
 0x1b4   : > { %1547 = vmatprep.subr.bf16.mxu1 %v1726_v43 }
 0x1b7   : > { %1548 = vmatpush3.bf16.msra.mxu1 %v1726_v43 }
 0x1b8   : > { %1549 = vmatprep.subr.bf16.mxu1 %v1727_v44 }
 0x1bb   : > { %1550 = vmatpush3.bf16.msra.mxu1 %v1727_v44 }
 0x1bc   : > { %1551 = vmatprep.subr.bf16.mxu1 %v1728_v45 }
 0x1bf   : > { %1552 = vmatpush3.bf16.msra.mxu1 %v1728_v45 }
 0x1c0   : > { %1553 = vmatprep.subr.bf16.mxu1 %v1729_v46 }
 0x1c3   : > { %1554 = vmatpush3.bf16.msra.mxu1 %v1729_v46 }
 0x226   : > { %v692_v9 = vpop.xlane.xlu0 %691 }
 0x227   : > { %v708_v10 = vmul.f32 0.0078125, %v692_v9 }
 0x229   : > { %v2345_v11 = vsub.f32 %v661_v47, %v708_v10  ;;  %v1730_v47 = vld [vmem:[#allocation7 + $0x30] sm:$0xff]   ;;  %v1431_v10 = vld [vmem:[%s2454_s4] ss:$0 sm:$0xff] }
 0x22a   : > { %v694_v12 = vpop.xlane.xlu0 %693  ;;  %1555 = vmatprep.subr.bf16.mxu1 %v1730_v47 }
 0x22b   : > { %v709_v13 = vmul.f32 0.0078125, %v694_v12  ;;  %v724_v14 = vmul.f32 %v2345_v11, %v2345_v11  ;;  %1556 = vmatpush3.bf16.msra.mxu1 %v1730_v47 }
 0x22c   : > { %1557 = vmatprep.subr.bf16.mxu1 %v1731_v48 }
 0x22d   : > { %v2349_v15 = vsub.f32 %v664_v49, %v709_v13  ;;  %732 = vadd.xlane.f32.xlu0 %v724_v14  ;;  %v1732_v49 = vld [vmem:[#allocation8] sm:$0xff]  }
 0x22e   : > { %v696_v16 = vpop.xlane.xlu1 %695  ;;  %1567 = vmatprep.subr.bf16.mxu0 %v1732_v49 }
 0x22f   : > { %v710_v17 = vmul.f32 0.0078125, %v696_v16  ;;  %v725_v18 = vmul.f32 %v2349_v15, %v2349_v15  ;;  %1558 = vmatpush3.bf16.msra.mxu1 %v1731_v48  ;;  %1568 = vmatpush3.bf16.msra.mxu0 %v1732_v49 }
 0x230   : > { %1569 = vmatprep.subr.bf16.mxu0 %v1733_v50 }
 0x231   : > { %v2353_v19 = vsub.f32 %v669_v55, %v710_v17  ;;  %734 = vadd.xlane.f32.xlu1 %v725_v18 }
 0x232   : > { %v698_v20 = vpop.xlane.xlu1 %697 }
 0x233   : > { %v711_v21 = vmul.f32 0.0078125, %v698_v20  ;;  %v726_v22 = vmul.f32 %v2353_v19, %v2353_v19  ;;  %1570 = vmatpush3.bf16.msra.mxu0 %v1733_v50 }
 0x234   : > { %1571 = vmatprep.subr.bf16.mxu0 %v1734_v51 }
 0x235   : > { %v2357_v23 = vsub.f32 %v672_v57, %v711_v21  ;;  %736 = vadd.xlane.f32.xlu0 %v726_v22 }
 0x236   : > { %v700_v24 = vpop.xlane.xlu0 %699 }
 0x237   : > { %v712_v25 = vmul.f32 0.0078125, %v700_v24  ;;  %v727_v26 = vmul.f32 %v2357_v23, %v2357_v23  ;;  %1572 = vmatpush3.bf16.msra.mxu0 %v1734_v51 }
 0x238   : > { %v702_v27 = vpop.xlane.xlu1 %701  ;;  %1573 = vmatprep.subr.bf16.mxu0 %v1735_v52 }
 0x239   : > { %v2361_v28 = vsub.f32 %v677_v63, %v712_v25  ;;  %v713_v29 = vmul.f32 0.0078125, %v702_v27  ;;  %738 = vadd.xlane.f32.xlu1 %v727_v26 }
 0x23b   : > { %v2363_v30 = vsub.f32 %v680_v0, %v713_v29  ;;  %v728_v31 = vmul.f32 %v2361_v28, %v2361_v28  ;;  %1574 = vmatpush3.bf16.msra.mxu0 %v1735_v52 }
 0x23c   : > { %1575 = vmatprep.subr.bf16.mxu0 %v1736_v53 }
 0x23d   : > { %740 = vadd.xlane.f32.xlu0 %v728_v31  ;;  %v729_v32 = vmul.f32 %v2363_v30, %v2363_v30 }
 0x23e   : > { %v704_v33 = vpop.xlane.xlu0 %703 }
 0x23f   : > { %v714_v34 = vmul.f32 0.0078125, %v704_v33  ;;  %742 = vadd.xlane.f32.xlu1 %v729_v32  ;;  %1576 = vmatpush3.bf16.msra.mxu0 %v1736_v53 }
 0x240   : > { %v706_v35 = vpop.xlane.xlu1 %705  ;;  %1577 = vmatprep.subr.bf16.mxu0 %v1737_v54 }
 0x241   : > { %v2369_v36 = vsub.f32 %v685_v7, %v714_v34  ;;  %v715_v37 = vmul.f32 0.0078125, %v706_v35 }
 0x243   : > { %v2371_v38 = vsub.f32 %v688_v8, %v715_v37  ;;  %v730_v39 = vmul.f32 %v2369_v36, %v2369_v36  ;;  %1578 = vmatpush3.bf16.msra.mxu0 %v1737_v54 }
 0x245   : > { %744 = vadd.xlane.f32.xlu0 %v730_v39  ;;  %v731_v40 = vmul.f32 %v2371_v38, %v2371_v38 }
 0x247   : > { %746 = vadd.xlane.f32.xlu1 %v731_v40 }
 0x2ba   : > { %v733_v55 = vpop.xlane.xlu0 %732 }
 0x2bb   : > { %v748_v56 = vmul.f32 0.0078125, %v733_v55 }
 0x2bd   : > { %v756_v57 = vadd.f32 1e-05, %v748_v56 }
 0x2be   : > { %v735_v58 = vpop.xlane.xlu1 %734 }
 0x2bf   : > { %1748 = vrsqrt.f32 %v756_v57  ;;  %v749_v59 = vmul.f32 0.0078125, %v735_v58 }
 0x2c1   : > { %v757_v60 = vadd.f32 1e-05, %v749_v59 }
 0x2c2   : > { %v737_v61 = vpop.xlane.xlu0 %736 }
 0x2c3   : > { %1750 = vrsqrt.f32 %v757_v60  ;;  %v750_v62 = vmul.f32 0.0078125, %v737_v61 }
 0x2c5   : > { %v758_v63 = vadd.f32 1e-05, %v750_v62  ;;  %v1738_v62 = vld [vmem:[#allocation8 + $0x30] sm:$0xff]  }
 0x2c6   : > { %v739_v0 = vpop.xlane.xlu1 %738  ;;  %1579 = vmatprep.subr.bf16.mxu0 %v1738_v62 }
 0x2c7   : > { %1752 = vrsqrt.f32 %v758_v63  ;;  %v751_v1 = vmul.f32 0.0078125, %v739_v0  ;;  %1580 = vmatpush3.bf16.msra.mxu0 %v1738_v62  ;;  %v1740_v63 = vld [vmem:[#allocation10] sm:$0xff]   ;;  %v1741_v0 = vld [vmem:[#allocation10 + $0x8] sm:$0xff]  }
 0x2c8   : > { %1591 = vmatprep.subr.bf16.mxu1 %v1740_v63 }
 0x2c9   : > { %v1749_v2 = vpop.eup %1748  ;;  %v759_v4 = vadd.f32 1e-05, %v751_v1  ;;  %v1742_v1 = vld [vmem:[#allocation10 + $0x10] sm:$0xff]  }
 0x2ca   : > { %v772_v5 = vmul.f32 %v1749_v2, %v2345_v11  ;;  %v741_v6 = vpop.xlane.xlu0 %740  ;;  %v1743_v2 = vld [vmem:[#allocation10 + $0x18] sm:$0xff]  }
 0x2cb   : > { %1754 = vrsqrt.f32 %v759_v4  ;;  %v752_v7 = vmul.f32 0.0078125, %v741_v6  ;;  %v1745_v4 = vld [vmem:[#allocation10 + $0x28] sm:$0xff]  }
 0x2cc   : > { %v743_v8 = vpop.xlane.xlu1 %742  ;;  %v787_v9 = vmul.f32 %v1430_v3, %v772_v5  ;;  %v1432_v5 = vld [vmem:[%s2456_s6] ss:$0 sm:$0xff] }
 0x2cd   : > { %v1751_v12 = vpop.eup %1750  ;;  %v760_v13 = vadd.f32 1e-05, %v752_v7  ;;  %v753_v14 = vmul.f32 0.0078125, %v743_v8 }
 0x2ce   : > { %v773_v16 = vmul.f32 %v1751_v12, %v2349_v15  ;;  %v802_v18 = vadd.f32 %v1431_v10, %v787_v9 }
 0x2cf   : > { %1756 = vrsqrt.f32 %v760_v13  ;;  %v761_v17 = vadd.f32 1e-05, %v753_v14 }
 0x2d0   : > { %v788_v20 = vmul.f32 %v1430_v3, %v773_v16 }
 0x2d1   : > { %v1753_v21 = vpop.eup %1752  ;;  %1758 = vrsqrt.f32 %v761_v17 }
 0x2d2   : > { %v774_v11 = vmul.f32 %v1753_v21, %v2353_v19  ;;  %v745_v22 = vpop.xlane.xlu0 %744  ;;  %v803_v24 = vadd.f32 %v1431_v10, %v788_v20  ;;  %1760 = vtanh.f32 %v802_v18 }
 0x2d3   : > { %v754_v25 = vmul.f32 0.0078125, %v745_v22 }
 0x2d4   : > { %v789_v26 = vmul.f32 %v1430_v3, %v774_v11  ;;  %v747_v27 = vpop.xlane.xlu1 %746  ;;  %1762 = vtanh.f32 %v803_v24 }
 0x2d5   : > { %v1755_v29 = vpop.eup %1754  ;;  %v762_v31 = vadd.f32 1e-05, %v754_v25  ;;  %v755_v32 = vmul.f32 0.0078125, %v747_v27 }
 0x2d6   : > { %v775_v15 = vmul.f32 %v1755_v29, %v2357_v23  ;;  %v804_v34 = vadd.f32 %v1431_v10, %v789_v26 }
 0x2d7   : > { %1764 = vrsqrt.f32 %v762_v31  ;;  %v763_v33 = vadd.f32 1e-05, %v755_v32 }
 0x2d8   : > { %v790_v35 = vmul.f32 %v1430_v3, %v775_v15 }
 0x2d9   : > { %v1757_v37 = vpop.eup %1756  ;;  %1766 = vrsqrt.f32 %v763_v33 }
 0x2da   : > { %v776_v19 = vmul.f32 %v1757_v37, %v2361_v28  ;;  %v805_v39 = vadd.f32 %v1431_v10, %v790_v35  ;;  %1768 = vtanh.f32 %v804_v34 }
 0x2db   : > { %v1759_v40 = vpop.eup %1758 }
 0x2dc   : > { %v791_v41 = vmul.f32 %v1430_v3, %v776_v19  ;;  %v777_v42 = vmul.f32 %v1759_v40, %v2363_v30  ;;  %1770 = vtanh.f32 %v805_v39  ;;  %v1761_v43 = vpop.eup %1760  ;;  %v1746_v39 = vld [vmem:[#allocation10 + $0x30] sm:$0xff]   ;;  %v1747_v40 = vld [vmem:[#allocation10 + $0x38] sm:$0xff]  }
 0x2de   : > { %v1763_v44 = vpop.eup %1762  ;;  %v792_v45 = vmul.f32 %v1430_v3, %v777_v42  ;;  %v806_v46 = vadd.f32 %v1431_v10, %v791_v41  ;;  %v1441_v41 = vld [vmem:[%s2487_s10] ss:$0 sm:$0xff]  ;;  %s1942_s10 = sshll.u32 %s2023_s8, 4  ;;  %s1943_s10 = int_to_ptr.vmem [resolvable:$false] %s1942_s10 }
 0x2df   : > { %v818_v23 = vpack.c.bf16 %v1763_v44, %v1761_v43  ;;  %s1944_s15 = scalar_lea.vmem %s1943_s10, 2048  ;;  %p1945_p11 = scmp.lt.s32.totalorder %s2407_s27, %s1943_s10 }
 0x2e0   : > { %v807_v47 = vadd.f32 %v1431_v10, %v792_v45  ;;  %1772 = vtanh.f32 %v806_v46  ;;  %p1946_p1 = scmp.lt.s32.totalorder %s1944_s15, %s1938_s28 }
 0x2e1   : > { %v1765_v48 = vpop.eup %1764  ;;  %1559 = vmatprep.mubr.bf16.mxu1 %v818_v23 }
 0x2e2   : > { %v778_v49 = vmul.f32 %v1765_v48, %v2369_v36  ;;  %1774 = vtanh.f32 %v807_v47  ;;  %p1947_p2 = por %p1946_p1, %p1945_p11 }
 0x2e3   : > { %v1767_v28 = vpop.eup %1766 }
 0x2e4   : > { %v793_v50 = vmul.f32 %v1430_v3, %v778_v49  ;;  %v779_v51 = vmul.f32 %v1767_v28, %v2371_v38  ;;  %v1769_v52 = vpop.eup %1768  ;;  %v1739_v38 = vld [vmem:[#allocation8 + $0x38] sm:$0xff]   ;;  %p1948_p12 = pnand %p1947_p2, %p1941_p7 }
 0x2e5   : > { %1581 = vmatprep.subr.bf16.mxu0 %v1739_v38 }
 0x2e6   : > { %v1771_v53 = vpop.eup %1770  ;;  %v794_v30 = vmul.f32 %v1430_v3, %v779_v51  ;;  %v808_v54 = vadd.f32 %v1431_v10, %v793_v50  ;;  %1582 = vmatpush3.bf16.msra.mxu0 %v1739_v38  ;;  %v1744_v3 = vld [vmem:[#allocation10 + $0x20] sm:$0xff]  }
 0x2e7   : > { %v819_v55 = vpack.c.bf16 %v1771_v53, %v1769_v52 }
 0x2e8   : > { %v809_v56 = vadd.f32 %v1431_v10, %v794_v30  ;;  %1776 = vtanh.f32 %v808_v54 }
 0x2e9   : > { %1560 = vmatmul.mubr.bf16.vlgmr.msra.gmra.mrb[0].mxu1 %v819_v55 }
 0x2ea   : > { %1778 = vtanh.f32 %v809_v56  ;;  %v1773_v57 = vpop.eup %1772  ;;  %1592 = vmatpush3.bf16.msra.mxu1 %v1740_v63 }
 0x2eb   : > { %1593 = vmatprep.subr.bf16.mxu1 %v1741_v0 }
 0x2ec   : > { %v1775_v58 = vpop.eup %1774 }
 0x2ed   : > { %v820_v59 = vpack.c.bf16 %v1775_v58, %v1773_v57 }
 0x2ee   : > { %1594 = vmatpush3.bf16.msra.mxu1 %v1741_v0 }
 0x2ef   : > { %1563 = vmatprep.mubr.bf16.mxu1 %v820_v59  ;;  %1595 = vmatprep.subr.bf16.mxu1 %v1742_v1 }
 0x2f2   : > { %v1777_v60 = vpop.eup %1776  ;;  %1596 = vmatpush3.bf16.msra.mxu1 %v1742_v1  ;;  %v1450_v1 = vld [vmem:[%s2488_s26] ss:$0 sm:$0xff] }
 0x2f3   : > { %1597 = vmatprep.subr.bf16.mxu1 %v1743_v2 }
 0x2f4   : > { %v1779_v36 = vpop.eup %1778 }
 0x2f5   : > { %v821_v61 = vpack.c.bf16 %v1779_v36, %v1777_v60 }
 0x2f6   : > { %1598 = vmatpush3.bf16.msra.mxu1 %v1743_v2 }
 0x2f7   : > { %1564 = vmatmul.mubr.bf16.gmra.mrb[4].mxu1 %v821_v61  ;;  %1599 = vmatprep.subr.bf16.mxu1 %v1744_v3 }
 0x2fa   : > { %1600 = vmatpush3.bf16.msra.mxu1 %v1744_v3 }
 0x2fb   : > { %1601 = vmatprep.subr.bf16.mxu1 %v1745_v4 }
 0x2fe   : > { %1602 = vmatpush3.bf16.msra.mxu1 %v1745_v4 }
 0x2ff   : > { %1603 = vmatprep.subr.bf16.mxu1 %v1746_v39 }
 0x302   : > { %1604 = vmatpush3.bf16.msra.mxu1 %v1746_v39 }
 0x303   : > { %1605 = vmatprep.subr.bf16.mxu1 %v1747_v40 }
 0x306   : > { %1606 = vmatpush3.bf16.msra.mxu1 %v1747_v40 }
 0x3bc   : > { %v1561_v6 = vpop.f32.mrb[0].mxu1 }
 0x3bd   : > { %v936_v7 = vadd.f32 %v1561_v6, %v1432_v5  ;;  %v927_v8 = vpop.f32.mrb[1].mxu1 }
 0x3be   : > { %v928_v9 = vadd.f32 %v1432_v5, %v927_v8  ;;  %v1562_v10 = vpop.f32.mrb[2].mxu1 }
 0x3bf   : > { %v939_v12 = vadd.f32 %v1562_v10, %v1432_v5  ;;  %v930_v13 = vpop.f32.mrb[3].mxu1  ;;  %v960_v16 = vmax.f32 %v936_v7, 0.0 }
 0x3c0   : > { %v931_v14 = vadd.f32 %v1432_v5, %v930_v13  ;;  %v958_v18 = vmax.f32 %v928_v9, 0.0 }
 0x3c1   : > { %v961_v17 = vmax.f32 %v939_v12, 0.0 }
 0x3c2   : > { %v959_v20 = vmax.f32 %v931_v14, 0.0 }
 0x3c3   : > { %v967_v21 = vpack.c.bf16 %v961_v17, %v960_v16 }
 0x3c4   : > { %v966_v11 = vpack.c.bf16 %v959_v20, %v958_v18 }
 0x3c6   : > { %1583 = vmatprep.mubr.bf16.mxu0 %v966_v11 }
 0x3c7   : > { %1584 = vmatmul.mubr.bf16.vlgmr.msra.gmra.mrb[16].mxu0 %v967_v21 }
 0x3ca   : > { %v1565_v22 = vpop.f32.mrb[4].mxu1 }
 0x3cb   : > { %v952_v24 = vadd.f32 %v1565_v22, %v1432_v5  ;;  %v943_v25 = vpop.f32.mrb[5].mxu1 }
 0x3cc   : > { %v944_v26 = vadd.f32 %v1432_v5, %v943_v25  ;;  %v1566_v27 = vpop.f32.mrb[6].mxu1 }
 0x3cd   : > { %v955_v29 = vadd.f32 %v1566_v27, %v1432_v5  ;;  %v946_v31 = vpop.f32.mrb[7].mxu1  ;;  %v964_v15 = vmax.f32 %v952_v24, 0.0 }
 0x3ce   : > { %v947_v32 = vadd.f32 %v1432_v5, %v946_v31  ;;  %v962_v34 = vmax.f32 %v944_v26, 0.0 }
 0x3cf   : > { %v965_v33 = vmax.f32 %v955_v29, 0.0 }
 0x3d0   : > { %v963_v35 = vmax.f32 %v947_v32, 0.0 }
 0x3d1   : > { %v969_v37 = vpack.c.bf16 %v965_v33, %v964_v15 }
 0x3d2   : > { %v968_v19 = vpack.c.bf16 %v963_v35, %v962_v34 }
 0x3d4   : > { %1587 = vmatprep.mubr.bf16.mxu0 %v968_v19 }
 0x3d5   : > { %1588 = vmatmul.mubr.bf16.gmra.mrb[20].mxu0 %v969_v37 }
 0x49a   : > { %v1585_v42 = vpop.f32.mrb[16].mxu0 }
 0x49b   : > { %v1084_v43 = vadd.f32 %v1585_v42, %v1441_v41  ;;  %v1075_v44 = vpop.f32.mrb[17].mxu0 }
 0x49c   : > { %v1076_v45 = vadd.f32 %v1441_v41, %v1075_v44  ;;  %v1586_v46 = vpop.f32.mrb[18].mxu0 }
 0x49d   : > { %v1087_v23 = vadd.f32 %v1586_v46, %v1441_v41  ;;  %v1078_v47 = vpop.f32.mrb[19].mxu0  ;;  %v1108_v49 = vmax.f32 %v1084_v43, 0.0 }
 0x49e   : > { %v1079_v48 = vadd.f32 %v1441_v41, %v1078_v47  ;;  %v1106_v50 = vmax.f32 %v1076_v45, 0.0 }
 0x49f   : > { %v1109_v28 = vmax.f32 %v1087_v23, 0.0 }
 0x4a0   : > { %v1107_v51 = vmax.f32 %v1079_v48, 0.0 }
 0x4a1   : > { %v1115_v52 = vpack.c.bf16 %v1109_v28, %v1108_v49 }
 0x4a2   : > { %v1114_v53 = vpack.c.bf16 %v1107_v51, %v1106_v50 }
 0x4a4   : > { %1607 = vmatprep.mubr.bf16.mxu1 %v1114_v53 }
 0x4a5   : > { %1608 = vmatmul.mubr.bf16.vlgmr.msra.gmra.mrb[8].mxu1 %v1115_v52 }
 0x4a8   : > { %v1589_v30 = vpop.f32.mrb[20].mxu0 }
 0x4a9   : > { %v1100_v54 = vadd.f32 %v1589_v30, %v1441_v41  ;;  %v1091_v55 = vpop.f32.mrb[21].mxu0 }
 0x4aa   : > { %v1092_v56 = vadd.f32 %v1441_v41, %v1091_v55  ;;  %v1590_v57 = vpop.f32.mrb[22].mxu0 }
 0x4ab   : > { %v1103_v58 = vadd.f32 %v1590_v57, %v1441_v41  ;;  %v1094_v59 = vpop.f32.mrb[23].mxu0  ;;  %v1112_v36 = vmax.f32 %v1100_v54, 0.0 }
 0x4ac   : > { %v1095_v60 = vadd.f32 %v1441_v41, %v1094_v59  ;;  %v1110_v62 = vmax.f32 %v1092_v56, 0.0 }
 0x4ad   : > { %v1113_v61 = vmax.f32 %v1103_v58, 0.0 }
 0x4ae   : > { %v1111_v38 = vmax.f32 %v1095_v60, 0.0 }
 0x4af   : > { %v1117_v63 = vpack.c.bf16 %v1113_v61, %v1112_v36 }
 0x4b0   : > { %v1116_v0 = vpack.c.bf16 %v1111_v38, %v1110_v62 }
 0x4b2   : > { %1611 = vmatprep.mubr.bf16.mxu1 %v1116_v0 }
 0x4b3   : > { %1612 = vmatmul.mubr.bf16.gmra.mrb[12].mxu1 %v1117_v63 }
 0x578   : > { %v1609_v2 = vpop.f32.mrb[8].mxu1 }
 0x579   : > { %v1232_v3 = vadd.f32 %v1609_v2, %v1450_v1  ;;  %v1223_v4 = vpop.f32.mrb[9].mxu1 }
 0x57a   : > { %v1224_v5 = vadd.f32 %v1450_v1, %v1223_v4  ;;  %v1610_v6 = vpop.f32.mrb[10].mxu1 }
 0x57b   : > { %1780 = vtanh.f32 %v1232_v3  ;;  %v1235_v7 = vadd.f32 %v1610_v6, %v1450_v1  ;;  %v1226_v8 = vpop.f32.mrb[11].mxu1 }
 0x57c   : > { %1782 = vtanh.f32 %v1224_v5  ;;  %v1227_v9 = vadd.f32 %v1450_v1, %v1226_v8 }
 0x57d   : > { %1784 = vtanh.f32 %v1235_v7 }
 0x57e   : > { %1786 = vtanh.f32 %v1227_v9 }
 0x585   : > { %v1781_v10 = vpop.eup %1780 }
 0x586   : > { %v1783_v12 = vpop.eup %1782  ;;  %1264 = vst [vmem:[%s463_s25 + $0x10] sm:$0xff] %v1781_v10  ;;  %v1613_v13 = vpop.f32.mrb[12].mxu1 }
 0x587   : > { %v1785_v14 = vpop.eup %1784  ;;  %1262 = vst [vmem:[%s463_s25] sm:$0xff] %v1783_v12  ;;  %v1248_v16 = vadd.f32 %v1613_v13, %v1450_v1  ;;  %v1239_v17 = vpop.f32.mrb[13].mxu1 }
 0x588   : > { %v1787_v18 = vpop.eup %1786  ;;  %1265 = vst [vmem:[%s463_s25 + $0x18] sm:$0xff] %v1785_v14  ;;  %v1240_v20 = vadd.f32 %v1450_v1, %v1239_v17  ;;  %v1614_v21 = vpop.f32.mrb[14].mxu1 }
 0x589   : > { %1263 = vst [vmem:[%s463_s25 + $0x8] sm:$0xff] %v1787_v18  ;;  %1788 = vtanh.f32 %v1248_v16  ;;  %v1251_v11 = vadd.f32 %v1614_v21, %v1450_v1  ;;  %v1242_v22 = vpop.f32.mrb[15].mxu1 }
 0x58a   : > { %1790 = vtanh.f32 %v1240_v20  ;;  %v1243_v24 = vadd.f32 %v1450_v1, %v1242_v22 }
 0x58b   : > { %1792 = vtanh.f32 %v1251_v11 }
 0x58c   : > { %1794 = vtanh.f32 %v1243_v24 }
 0x593   : > { %v1789_v25 = vpop.eup %1788 }
 0x594   : > { %v1791_v26 = vpop.eup %1790  ;;  %1268 = vst [vmem:[%s463_s25 + $0x30] sm:$0xff] %v1789_v25 }
 0x595   : > { %v1793_v27 = vpop.eup %1792  ;;  %1266 = vst [vmem:[%s463_s25 + $0x20] sm:$0xff] %v1791_v26 }
 0x596   : > { %v1795_v29 = vpop.eup %1794  ;;  %1269 = vst [vmem:[%s463_s25 + $0x38] sm:$0xff] %v1793_v27 }
 0x597   : > { %1267 = vst [vmem:[%s463_s25 + $0x28] sm:$0xff] %v1795_v29 }
 0x598   : > { %1951 = shalt.err (!%p1948_p12)
}
 0x599   : > { %s1952_s16 = scalar_lea.hbm %s2405_s14, 1024  ;;  %s1956_s25 = scalar_lea.hbm %s2489_s11, 4096 }
 0x59a   : > { %p1953_p9 = scmp.ne.s32.totalorder %s2405_s14, %s1952_s16  ;;  %p1957_p4 = scmp.lt.u32.totalorder %s2405_s14, %s2489_s11 }
 0x59b   : > { %p1958_p8 = scmp.lt.u32.totalorder %s1956_s25, %s1952_s16  ;;  %p1960_p3 = scmp.lt.u32.totalorder %s1952_s16, %s2405_s14 }
 0x59c   : > { %p1954_p13 = pnand %p1953_p9, %p2256_p0 }
 0x59d   : > { %p1959_p6 = por %p1958_p8, %p1957_p4 }
 0x59e   : > { %p1955_p10 = pneg %p1954_p13 }
 0x59f   : > { %p1961_p5 = por %p1960_p3, %p1959_p6 }
 0x5a1   : > { %p1962_p7 = pnand %p1961_p5, %p1955_p10 }
 0x5a3   : > { %1965 = shalt.err (!%p1962_p7)
}
 0x5a4   : > { %s2024_s30 = smov 128   ;;  %s2025_s28 = smov 8  }
 0x5a5   : > { %1633 = dma.vmem_to_hbm [thread:$0]  (%p2256_p0), %s2407_s27, 1024, %s2405_s14, %s1271_s21, %s2024_s30, %s2024_s30, %s2025_s28  }
 0x5a6 PF: > { %s2490_s8 = sld [smem:[#allocation16_spill]]  ;;  %s2491_s10 = sld [smem:[#allocation17_spill]] }
 0x5a7   : > { %p1665_p11 = scmp.ge.s32.totalorder %s2012_s20, 2 }
 0x5ac   : > { %s1299_s15 = sand.u32 1, %s2490_s8   ;;  %p2492_p1 = scmp.ne.s32.totalorder %s2491_s10, 0 }
 0x5ad   : > { %s1300_s16 = scalar_lea.sflag [#allocation4], %s1299_s15 }
 0x5ae   : > { %p1653_p2 = pnand %p1665_p11, %p2492_p1 }
 0x5b0   : > { %1995 = dma.done.wait (!%p1653_p2), %s1300_s16, 1024  }
 0x5b1   : > { %1997 = vsyncadd (!%p1653_p2), %s1300_s16, 4294966272  ;;  %p26_p12 = scmp.ge.s32.totalorder %s2246_s24, 6   ;;  %s2493_s17 = smov %s2004_s18 }
 0x5b2   : > { %s2494_s18 = smov %s2008_s19  ;;  %s2495_s19 = smov %s2262_s22 }
 0x5b3   : > { %s2496_s20 = smov %s2246_s24  ;;  %28 = sbr.rel (!%p26_p12) target bundleno = 11 (0xb), region = 125 }
 0x5ba   :  { %1305 = vsyncpa [#allocation3], 1 }
 0x5bb   :  { %1307 = vsyncpa [#allocation3 + $0x1], 1 }
 0x5bc   :  { %1308 = vsyncpa [#allocation6], 1 }
 0x5bd   :  { %1309 = vsyncpa [#allocation9], 1 }
 0x5be   :  { %1310 = vsyncpa [#allocation4], 1 }
 0x5bf   :  { %1312 = vsyncpa [#allocation4 + $0x1], 1 }

</bundles_post_ra>
